<compile_context>
chip_gen: v6e
topology: v6e:2x2x1
jax: 0.10.0
libtpu: 0.0.40
codegen_flags: <defaults>
</compile_context>

<pallas_src>
import math

import numpy as np
import jax
import jax.numpy as jnp
from jax.experimental import pallas as pl
from jax.experimental.pallas import tpu as pltpu


# ----------------------------------------------------------------------------
# tiny constant helpers (built once in numpy)
# ----------------------------------------------------------------------------
def _build_mask(H, W, Lpa):
    """(1, Lpa) interior mask: 1 at interior padded positions, 0 at pads/gap."""
    Hp, Wp = H + 2, W + 2
    m = np.zeros((Hp, Wp), np.float32)
    m[1:H + 1, 1:W + 1] = 1.0
    flat = np.zeros((Lpa,), np.float32)
    flat[:Hp * Wp] = m.reshape(-1)
    return jnp.asarray(flat.reshape(1, Lpa))


def _build_pool(H, W, Lpa):
    """(Lpa, Lo) fused 2x2-avg-pool + stride-2 decimation matrix (bf16)."""
    Hp, Wp = H + 2, W + 2
    Ho, Wo = H // 2, W // 2
    P = np.zeros((Lpa, Ho * Wo), np.float32)
    for io in range(Ho):
        for jo in range(Wo):
            o = io * Wo + jo
            for di in (0, 1):
                for dj in (0, 1):
                    p = (2 * io + 1 + di) * Wp + (2 * jo + 1 + dj)
                    P[p, o] = 0.25
    return jnp.asarray(P, dtype=jnp.bfloat16)


# ----------------------------------------------------------------------------
# the Pallas kernel (B images per grid step, statically unrolled per image)
# ----------------------------------------------------------------------------
def _make_dblock_kernel(Cin, Cout, Wp, Lpa, Lo, B):
    offs = [(dy - 1) * Wp + (dx - 1) for dy in range(3) for dx in range(3)]
    K2 = 9 * Cout + Cin                    # conv2 + shortcut contraction depth

    def shift_lanes(v, off):
        # result[:, p] == v[:, p + off] wherever p + off is in [0, Lpa); the few
        # wrapped columns only land at non-interior positions, which the pool
        # matrix zero-weights, so the wrap-around is harmless (and finite).
        if off == 0:
            return v
        s = off % Lpa
        return jnp.concatenate([v[:, s:], v[:, :s]], axis=1)

    def kernel(xim_ref, w1_ref, b1_ref, w2_ref, b2_ref, mask_ref, pool_ref,
               o_ref, him_ref):
        w1m = w1_ref[...]                  # (Cout, 9*Cin)      bf16
        w2m = w2_ref[...]                  # (Cout, 9*Cout+Cin) bf16
        b1v = b1_ref[...]                  # (Cout, 1)          f32
        b2v = b2_ref[...]                  # (Cout, 1)          f32  (b2 + bsc)
        maskv = mask_ref[...]              # (1, Lpa)           f32

        for b in range(B):                 # images of this block (static unroll)
            c0 = b * Lpa                   # lane-aligned image offset

            # conv1 (3x3, pad 1): single matmul on the wrapper-built im2col
            acc1 = jnp.dot(w1m, xim_ref[:, c0:c0 + Lpa],
                           preferred_element_type=jnp.float32)
            # ReLU + re-pad mask (zeros the padding ring and the gap columns)
            h1b = (jnp.maximum(acc1 + b1v, 0.0) * maskv).astype(jnp.bfloat16)

            # conv2 im2col: 9 shifted copies of h1 + center-tap x rows for the
            # 1x1 shortcut, all stored lane-aligned into the VMEM scratch.
            for k, off in enumerate(offs):
                him_ref[k * Cout:(k + 1) * Cout, :] = shift_lanes(h1b, off)
            him_ref[9 * Cout:K2, :] = xim_ref[4 * Cin:5 * Cin, c0:c0 + Lpa]

            # conv2 (3x3, pad 1) + 1x1 shortcut: single matmul, K = 9*Cout+Cin
            tot = jnp.dot(w2m, him_ref[...],
                          preferred_element_type=jnp.float32) + b2v

            # fused 2x2 avg pool + decimation: single bf16 matmul, K = Lpa
            out_b = jnp.dot(tot.astype(jnp.bfloat16), pool_ref[...],
                            preferred_element_type=jnp.float32)
            o_ref[:, b * Lo:(b + 1) * Lo] = out_b.astype(o_ref.dtype)

    return kernel


# ----------------------------------------------------------------------------
# spectral normalization glue (matches SpectralNorm._power_iteration, 1 iter)
# TODO(synk): the training-mode in-place update of the sn_u / sn_sigma buffers
# is a stateful side effect and is not replicated (inference semantics).
# ----------------------------------------------------------------------------
def _sn(weight, u, num_iters=1, eps=1e-12):
    Wm = weight.reshape(weight.shape[0], -1)

    def _norm(v):
        return v / jnp.maximum(jnp.linalg.norm(v), eps)

    v = None
    for _ in range(num_iters):
        v = _norm(u @ Wm)
        u = _norm(v @ Wm.T)
    sigma = (u @ (Wm @ v.T))[0, 0]
    return weight / sigma


# ----------------------------------------------------------------------------
# wrapper: NCHW in / NCHW out (like the PyTorch module)
# ----------------------------------------------------------------------------
def dblock_optimized_forward(x, params, block_batch=8):
    N, Cin, H, W = x.shape
    Cout = params["w1"].shape[0]
    assert H % 2 == 0 and W % 2 == 0

    # spectrally-normalized weights (glue)
    w1 = _sn(params["w1"], params["u1"])
    w2 = _sn(params["w2"], params["u2"])
    wsc = _sn(params["wsc"], params["usc"])

    Hp, Wp = H + 2, W + 2
    Lp = Hp * Wp
    Lpa = ((Lp + 127) // 128) * 128          # lane-aligned per-image stride
    Ho, Wo = H // 2, W // 2
    Lo = Ho * Wo

    B = max(1, min(block_batch, N))
    if N > 1:
        B = min(B, -(-N // 2))               # keep G >= 2 (both v7x TensorCores)
    G = -(-N // B)
    Npad = G * B

    # ---- glue: NCHW -> per-image 3x3 im2col, lane-aligned flat layout, bf16 ----
    xb = x
    if Npad != N:
        xb = jnp.pad(xb, ((0, Npad - N), (0, 0), (0, 0), (0, 0)))
    xpp = jnp.pad(xb, ((0, 0), (0, 0), (2, 2), (2, 2)))        # (Npad,Cin,H+4,W+4)
    cols = [xpp[:, :, dy:dy + Hp, dx:dx + Wp]
            for dy in range(3) for dx in range(3)]
    xim = jnp.stack(cols, axis=1).reshape(Npad, 9 * Cin, Lp)   # row = k*Cin + c
    xim = jnp.pad(xim, ((0, 0), (0, 0), (0, Lpa - Lp)))
    xim = (xim.reshape(G, B, 9 * Cin, Lpa)
              .transpose(0, 2, 1, 3)
              .reshape(G, 9 * Cin, B * Lpa)
              .astype(jnp.bfloat16))

    # weights in kernel layout, bf16 for the MXU
    w1_mat = jnp.transpose(w1, (0, 2, 3, 1)).reshape(Cout, 9 * Cin).astype(jnp.bfloat16)
    w2_mat = jnp.transpose(w2, (0, 2, 3, 1)).reshape(Cout, 9 * Cout)
    wsc_mat = wsc[:, :, 0, 0]                                   # (Cout, Cin)
    w2_cat = jnp.concatenate([w2_mat, wsc_mat], axis=1).astype(jnp.bfloat16)
    b1 = params["b1"].reshape(Cout, 1).astype(jnp.float32)
    b2 = (params["b2"] + params["bsc"]).reshape(Cout, 1).astype(jnp.float32)

    mask = _build_mask(H, W, Lpa)                               # (1, Lpa)  f32
    pool = _build_pool(H, W, Lpa)                               # (Lpa, Lo) bf16

    kernel = _make_dblock_kernel(Cin, Cout, Wp, Lpa, Lo, B)

    grid_spec = pltpu.PrefetchScalarGridSpec(
        num_scalar_prefetch=0,
        grid=(G,),
        in_specs=[
            pl.BlockSpec((None, 9 * Cin, B * Lpa), lambda g: (g, 0, 0)),   # x im2col
            pl.BlockSpec((Cout, 9 * Cin), lambda g: (0, 0)),               # W1
            pl.BlockSpec((Cout, 1), lambda g: (0, 0)),                     # b1
            pl.BlockSpec((Cout, 9 * Cout + Cin), lambda g: (0, 0)),        # [W2 | Wsc]
            pl.BlockSpec((Cout, 1), lambda g: (0, 0)),                     # b2 + bsc
            pl.BlockSpec((1, Lpa), lambda g: (0, 0)),                      # interior mask
            pl.BlockSpec((Lpa, Lo), lambda g: (0, 0)),                     # pool matrix
        ],
        out_specs=pl.BlockSpec((None, Cout, B * Lo), lambda g: (g, 0, 0)),
        scratch_shapes=[pltpu.VMEM((9 * Cout + Cin, Lpa), jnp.bfloat16)],
    )

    out = pl.pallas_call(
        kernel,
        out_shape=jax.ShapeDtypeStruct((G, Cout, B * Lo), jnp.float32),
        grid_spec=grid_spec,
        compiler_params=pltpu.CompilerParams(dimension_semantics=("parallel",)),
    )(xim, w1_mat, b1, w2_cat, b2, mask, pool)

    # kernel output is already per-image NCHW ordered; just reshape back
    out = out.reshape(G, Cout, B, Ho, Wo).transpose(0, 2, 1, 3, 4)
    out = out.reshape(Npad, Cout, Ho, Wo)[:N]
    return out


# ----------------------------------------------------------------------------
# pure-JAX reference (for a sanity check only)
# ----------------------------------------------------------------------------
def _conv2d_nchw(x, w, b, pad):
    out = jax.lax.conv_general_dilated(
        x, w, window_strides=(1, 1), padding=[(pad, pad), (pad, pad)],
        dimension_numbers=("NCHW", "OIHW", "NCHW"))
    return out + b[None, :, None, None]


def _avg_pool2(x):
    s = jax.lax.reduce_window(x, 0.0, jax.lax.add, (1, 1, 2, 2), (1, 1, 2, 2), "VALID")
    return s * 0.25


def reference_forward(x, params):
    w1 = _sn(params["w1"], params["u1"])
    w2 = _sn(params["w2"], params["u2"])
    wsc = _sn(params["wsc"], params["usc"])
    h = jnp.maximum(_conv2d_nchw(x, w1, params["b1"], 1), 0.0)
    h = _avg_pool2(_conv2d_nchw(h, w2, params["b2"], 1))
    sc = _conv2d_nchw(_avg_pool2(x), wsc, params["bsc"], 0)
    return h + sc


# ----------------------------------------------------------------------------
# deterministic parameter init (mirrors the module's __init__ shapes)
# ----------------------------------------------------------------------------
def _xavier_uniform(key, shape, gain):
    fan_out = shape[0] * shape[2] * shape[3]
    fan_in = shape[1] * shape[2] * shape[3]
    bound = gain * math.sqrt(6.0 / (fan_in + fan_out))
    return jax.random.uniform(key, shape, jnp.float32, -bound, bound)


def _conv_bias(key, shape):
    fan_in = shape[1] * shape[2] * shape[3]
    bound = 1.0 / math.sqrt(fan_in)
    return jax.random.uniform(key, (shape[0],), jnp.float32, -bound, bound)


if __name__ == "__main__":
    N, Cin, Cout, H, W = 2, 4, 8, 16, 16
    key = jax.random.PRNGKey(0)
    ks = jax.random.split(key, 10)
    params = {
        "w1": _xavier_uniform(ks[0], (Cout, Cin, 3, 3), math.sqrt(2.0)),
        "b1": _conv_bias(ks[1], (Cout, Cin, 3, 3)),
        "u1": jax.random.normal(ks[2], (1, Cout), jnp.float32),
        "w2": _xavier_uniform(ks[3], (Cout, Cout, 3, 3), math.sqrt(2.0)),
        "b2": _conv_bias(ks[4], (Cout, Cout, 3, 3)),
        "u2": jax.random.normal(ks[5], (1, Cout), jnp.float32),
        "wsc": _xavier_uniform(ks[6], (Cout, Cin, 1, 1), 1.0),
        "bsc": _conv_bias(ks[7], (Cout, Cin, 1, 1)),
        "usc": jax.random.normal(ks[8], (1, Cout), jnp.float32),
    }
    x = jax.random.normal(ks[9], (N, Cin, H, W), jnp.float32)

    out = dblock_optimized_forward(x, params)
    out = jax.block_until_ready(out)

    ref = reference_forward(x, params)
    assert out.shape == (N, Cout, H // 2, W // 2), out.shape
    # conv/pool path runs in bf16 on the MXU (f32 accumulation): bf16-level error
    err = float(jnp.max(jnp.abs(out - ref)) / (jnp.max(jnp.abs(ref)) + 1e-6))
    assert err < 3e-2, f"mismatch vs reference: normalized max error {err}"
    print("KERNEL_OK")
</pallas_src>

<mosaic_0001>
module attributes {stable_mosaic.version = 11 : i64} {
  func.func @kernel(%arg0: i32, %arg1: memref<1x36x384xbf16, #tpu.memory_space<vmem>>, %arg2: memref<8x36xbf16, #tpu.memory_space<vmem>>, %arg3: memref<8x1xf32, #tpu.memory_space<vmem>>, %arg4: memref<8x76xbf16, #tpu.memory_space<vmem>>, %arg5: memref<8x1xf32, #tpu.memory_space<vmem>>, %arg6: memref<1x384xf32, #tpu.memory_space<vmem>>, %arg7: memref<384x64xbf16, #tpu.memory_space<vmem>>, %arg8: memref<1x8x64xf32, #tpu.memory_space<vmem>>, %arg9: memref<76x384xbf16, #tpu.memory_space<vmem>>) attributes {dimension_semantics = [#tpu.dimension_semantics<parallel>], iteration_bounds = array<i64: 2>, scalar_prefetch = 0 : i64, scratch_operands = 1 : i64, tpu.core_type = #tpu.core_type<tc>, window_params = [{transform_indices = @transform_0, window_bounds = array<i64: 1, 36, 384>}, {pipeline_mode = #tpu.pipeline_mode<synchronous>, transform_indices = @transform_1, window_bounds = array<i64: 8, 36>}, {pipeline_mode = #tpu.pipeline_mode<synchronous>, transform_indices = @transform_2, window_bounds = array<i64: 8, 1>}, {pipeline_mode = #tpu.pipeline_mode<synchronous>, transform_indices = @transform_3, window_bounds = array<i64: 8, 76>}, {pipeline_mode = #tpu.pipeline_mode<synchronous>, transform_indices = @transform_4, window_bounds = array<i64: 8, 1>}, {pipeline_mode = #tpu.pipeline_mode<synchronous>, transform_indices = @transform_5, window_bounds = array<i64: 1, 384>}, {pipeline_mode = #tpu.pipeline_mode<synchronous>, transform_indices = @transform_6, window_bounds = array<i64: 384, 64>}, {transform_indices = @transform_7, window_bounds = array<i64: 1, 8, 64>}]} {
    %c0 = arith.constant 0 : index
    %c0_0 = arith.constant 0 : index
    %0 = vector.load %arg2[%c0, %c0_0] : memref<8x36xbf16, #tpu.memory_space<vmem>>, vector<8x36xbf16>
    %c0_1 = arith.constant 0 : index
    %c0_2 = arith.constant 0 : index
    %1 = vector.load %arg4[%c0_1, %c0_2] : memref<8x76xbf16, #tpu.memory_space<vmem>>, vector<8x76xbf16>
    %c0_3 = arith.constant 0 : index
    %c0_4 = arith.constant 0 : index
    %2 = vector.load %arg3[%c0_3, %c0_4] : memref<8x1xf32, #tpu.memory_space<vmem>>, vector<8x1xf32>
    %c0_5 = arith.constant 0 : index
    %c0_6 = arith.constant 0 : index
    %3 = vector.load %arg5[%c0_5, %c0_6] : memref<8x1xf32, #tpu.memory_space<vmem>>, vector<8x1xf32>
    %c0_7 = arith.constant 0 : index
    %c0_8 = arith.constant 0 : index
    %4 = vector.load %arg6[%c0_7, %c0_8] : memref<1x384xf32, #tpu.memory_space<vmem>>, vector<1x384xf32>
    %c0_9 = arith.constant 0 : index
    %c0_10 = arith.constant 0 : index
    %c0_11 = arith.constant 0 : index
    %5 = vector.load %arg1[%c0_9, %c0_10, %c0_11] : memref<1x36x384xbf16, #tpu.memory_space<vmem>>, vector<1x36x384xbf16>
    %6 = vector.shape_cast %5 : vector<1x36x384xbf16> to vector<36x384xbf16>
    %cst = arith.constant dense<0.000000e+00> : vector<8x384xf32>
    %7 = tpu.matmul %0, %6, %cst {dimension_numbers = #tpu.dot_dimension_numbers<[1], [0], [0], [1], [0, 0, 1, 1], [], []>} : vector<8x36xbf16>, vector<36x384xbf16>, vector<8x384xf32> -> vector<8x384xf32>
    %8 = vector.broadcast %2 : vector<8x1xf32> to vector<8x384xf32>
    %9 = arith.addf %7, %8 : vector<8x384xf32>
    %cst_12 = arith.constant 0.000000e+00 : f32
    %10 = vector.broadcast %cst_12 : f32 to vector<8x384xf32>
    %11 = arith.maximumf %9, %10 : vector<8x384xf32>
    %12 = vector.broadcast %4 : vector<1x384xf32> to vector<8x384xf32>
    %13 = arith.mulf %11, %12 : vector<8x384xf32>
    %14 = arith.truncf %13 : vector<8x384xf32> to vector<8x384xbf16>
    %15 = vector.extract_strided_slice %14 {offsets = [0, 365], sizes = [8, 19], strides = [1, 1]} : vector<8x384xbf16> to vector<8x19xbf16>
    %16 = vector.extract_strided_slice %14 {offsets = [0, 0], sizes = [8, 365], strides = [1, 1]} : vector<8x384xbf16> to vector<8x365xbf16>
    %17 = tpu.concatenate %15, %16 in 1 : vector<8x19xbf16>, vector<8x365xbf16> -> vector<8x384xbf16>
    %c0_13 = arith.constant 0 : index
    %c0_14 = arith.constant 0 : index
    %18 = vector.load %arg9[%c0_13, %c0_14] : memref<76x384xbf16, #tpu.memory_space<vmem>>, vector<8x384xbf16>
    tpu.vector_store %arg9[%c0_13, %c0_14], %17 {strides = array<i32>} : memref<76x384xbf16, #tpu.memory_space<vmem>>, vector<8x384xbf16>,
    %19 = vector.extract_strided_slice %14 {offsets = [0, 366], sizes = [8, 18], strides = [1, 1]} : vector<8x384xbf16> to vector<8x18xbf16>
    %20 = vector.extract_strided_slice %14 {offsets = [0, 0], sizes = [8, 366], strides = [1, 1]} : vector<8x384xbf16> to vector<8x366xbf16>
    %21 = tpu.concatenate %19, %20 in 1 : vector<8x18xbf16>, vector<8x366xbf16> -> vector<8x384xbf16>
    %c8 = arith.constant 8 : index
    %c0_15 = arith.constant 0 : index
    %22 = vector.load %arg9[%c8, %c0_15] : memref<76x384xbf16, #tpu.memory_space<vmem>>, vector<8x384xbf16>
    tpu.vector_store %arg9[%c8, %c0_15], %21 {strides = array<i32>} : memref<76x384xbf16, #tpu.memory_space<vmem>>, vector<8x384xbf16>,
    %23 = vector.extract_strided_slice %14 {offsets = [0, 367], sizes = [8, 17], strides = [1, 1]} : vector<8x384xbf16> to vector<8x17xbf16>
    %24 = vector.extract_strided_slice %14 {offsets = [0, 0], sizes = [8, 367], strides = [1, 1]} : vector<8x384xbf16> to vector<8x367xbf16>
    %25 = tpu.concatenate %23, %24 in 1 : vector<8x17xbf16>, vector<8x367xbf16> -> vector<8x384xbf16>
    %c16 = arith.constant 16 : index
    %c0_16 = arith.constant 0 : index
    %26 = vector.load %arg9[%c16, %c0_16] : memref<76x384xbf16, #tpu.memory_space<vmem>>, vector<8x384xbf16>
    tpu.vector_store %arg9[%c16, %c0_16], %25 {strides = array<i32>} : memref<76x384xbf16, #tpu.memory_space<vmem>>, vector<8x384xbf16>,
    %27 = vector.extract_strided_slice %14 {offsets = [0, 383], sizes = [8, 1], strides = [1, 1]} : vector<8x384xbf16> to vector<8x1xbf16>
    %28 = vector.extract_strided_slice %14 {offsets = [0, 0], sizes = [8, 383], strides = [1, 1]} : vector<8x384xbf16> to vector<8x383xbf16>
    %29 = tpu.concatenate %27, %28 in 1 : vector<8x1xbf16>, vector<8x383xbf16> -> vector<8x384xbf16>
    %c24 = arith.constant 24 : index
    %c0_17 = arith.constant 0 : index
    %30 = vector.load %arg9[%c24, %c0_17] : memref<76x384xbf16, #tpu.memory_space<vmem>>, vector<8x384xbf16>
    tpu.vector_store %arg9[%c24, %c0_17], %29 {strides = array<i32>} : memref<76x384xbf16, #tpu.memory_space<vmem>>, vector<8x384xbf16>,
    %c32 = arith.constant 32 : index
    %c0_18 = arith.constant 0 : index
    %31 = vector.load %arg9[%c32, %c0_18] : memref<76x384xbf16, #tpu.memory_space<vmem>>, vector<8x384xbf16>
    tpu.vector_store %arg9[%c32, %c0_18], %14 {strides = array<i32>} : memref<76x384xbf16, #tpu.memory_space<vmem>>, vector<8x384xbf16>,
    %32 = vector.extract_strided_slice %14 {offsets = [0, 1], sizes = [8, 383], strides = [1, 1]} : vector<8x384xbf16> to vector<8x383xbf16>
    %33 = vector.extract_strided_slice %14 {offsets = [0, 0], sizes = [8, 1], strides = [1, 1]} : vector<8x384xbf16> to vector<8x1xbf16>
    %34 = tpu.concatenate %32, %33 in 1 : vector<8x383xbf16>, vector<8x1xbf16> -> vector<8x384xbf16>
    %c40 = arith.constant 40 : index
    %c0_19 = arith.constant 0 : index
    %35 = vector.load %arg9[%c40, %c0_19] : memref<76x384xbf16, #tpu.memory_space<vmem>>, vector<8x384xbf16>
    tpu.vector_store %arg9[%c40, %c0_19], %34 {strides = array<i32>} : memref<76x384xbf16, #tpu.memory_space<vmem>>, vector<8x384xbf16>,
    %36 = vector.extract_strided_slice %14 {offsets = [0, 17], sizes = [8, 367], strides = [1, 1]} : vector<8x384xbf16> to vector<8x367xbf16>
    %37 = vector.extract_strided_slice %14 {offsets = [0, 0], sizes = [8, 17], strides = [1, 1]} : vector<8x384xbf16> to vector<8x17xbf16>
    %38 = tpu.concatenate %36, %37 in 1 : vector<8x367xbf16>, vector<8x17xbf16> -> vector<8x384xbf16>
    %c48 = arith.constant 48 : index
    %c0_20 = arith.constant 0 : index
    %39 = vector.load %arg9[%c48, %c0_20] : memref<76x384xbf16, #tpu.memory_space<vmem>>, vector<8x384xbf16>
    tpu.vector_store %arg9[%c48, %c0_20], %38 {strides = array<i32>} : memref<76x384xbf16, #tpu.memory_space<vmem>>, vector<8x384xbf16>,
    %40 = vector.extract_strided_slice %14 {offsets = [0, 18], sizes = [8, 366], strides = [1, 1]} : vector<8x384xbf16> to vector<8x366xbf16>
    %41 = vector.extract_strided_slice %14 {offsets = [0, 0], sizes = [8, 18], strides = [1, 1]} : vector<8x384xbf16> to vector<8x18xbf16>
    %42 = tpu.concatenate %40, %41 in 1 : vector<8x366xbf16>, vector<8x18xbf16> -> vector<8x384xbf16>
    %c56 = arith.constant 56 : index
    %c0_21 = arith.constant 0 : index
    %43 = vector.load %arg9[%c56, %c0_21] : memref<76x384xbf16, #tpu.memory_space<vmem>>, vector<8x384xbf16>
    tpu.vector_store %arg9[%c56, %c0_21], %42 {strides = array<i32>} : memref<76x384xbf16, #tpu.memory_space<vmem>>, vector<8x384xbf16>,
    %44 = vector.extract_strided_slice %14 {offsets = [0, 19], sizes = [8, 365], strides = [1, 1]} : vector<8x384xbf16> to vector<8x365xbf16>
    %45 = vector.extract_strided_slice %14 {offsets = [0, 0], sizes = [8, 19], strides = [1, 1]} : vector<8x384xbf16> to vector<8x19xbf16>
    %46 = tpu.concatenate %44, %45 in 1 : vector<8x365xbf16>, vector<8x19xbf16> -> vector<8x384xbf16>
    %c64 = arith.constant 64 : index
    %c0_22 = arith.constant 0 : index
    %47 = vector.load %arg9[%c64, %c0_22] : memref<76x384xbf16, #tpu.memory_space<vmem>>, vector<8x384xbf16>
    tpu.vector_store %arg9[%c64, %c0_22], %46 {strides = array<i32>} : memref<76x384xbf16, #tpu.memory_space<vmem>>, vector<8x384xbf16>,
    %c0_23 = arith.constant 0 : index
    %c16_24 = arith.constant 16 : index
    %c0_25 = arith.constant 0 : index
    %48 = vector.load %arg1[%c0_23, %c16_24, %c0_25] : memref<1x36x384xbf16, #tpu.memory_space<vmem>>, vector<1x4x384xbf16>
    %49 = vector.shape_cast %48 : vector<1x4x384xbf16> to vector<4x384xbf16>
    %c72 = arith.constant 72 : index
    %c0_26 = arith.constant 0 : index
    %50 = vector.load %arg9[%c72, %c0_26] : memref<76x384xbf16, #tpu.memory_space<vmem>>, vector<4x384xbf16>
    tpu.vector_store %arg9[%c72, %c0_26], %49 {strides = array<i32>} : memref<76x384xbf16, #tpu.memory_space<vmem>>, vector<4x384xbf16>,
    %c0_27 = arith.constant 0 : index
    %c0_28 = arith.constant 0 : index
    %51 = vector.load %arg9[%c0_27, %c0_28] : memref<76x384xbf16, #tpu.memory_space<vmem>>, vector<76x384xbf16>
    %cst_29 = arith.constant dense<0.000000e+00> : vector<8x384xf32>
    %52 = tpu.matmul %1, %51, %cst_29 {dimension_numbers = #tpu.dot_dimension_numbers<[1], [0], [0], [1], [0, 0, 1, 1], [], []>} : vector<8x76xbf16>, vector<76x384xbf16>, vector<8x384xf32> -> vector<8x384xf32>
    %53 = vector.broadcast %3 : vector<8x1xf32> to vector<8x384xf32>
    %54 = arith.addf %52, %53 : vector<8x384xf32>
    %55 = arith.truncf %54 : vector<8x384xf32> to vector<8x384xbf16>
    %c0_30 = arith.constant 0 : index
    %c0_31 = arith.constant 0 : index
    %56 = vector.load %arg7[%c0_30, %c0_31] : memref<384x64xbf16, #tpu.memory_space<vmem>>, vector<384x64xbf16>
    %cst_32 = arith.constant dense<0.000000e+00> : vector<8x64xf32>
    %57 = tpu.matmul %55, %56, %cst_32 {dimension_numbers = #tpu.dot_dimension_numbers<[1], [0], [0], [1], [0, 0, 1, 1], [], []>} : vector<8x384xbf16>, vector<384x64xbf16>, vector<8x64xf32> -> vector<8x64xf32>
    %c0_33 = arith.constant 0 : index
    %c0_34 = arith.constant 0 : index
    %c0_35 = arith.constant 0 : index
    %58 = vector.load %arg8[%c0_33, %c0_34, %c0_35] : memref<1x8x64xf32, #tpu.memory_space<vmem>>, vector<1x8x64xf32>
    %59 = vector.shape_cast %58 : vector<1x8x64xf32> to vector<8x64xf32>
    %60 = vector.shape_cast %57 : vector<8x64xf32> to vector<1x8x64xf32>
    tpu.vector_store %arg8[%c0_33, %c0_34, %c0_35], %60 {strides = array<i32>} : memref<1x8x64xf32, #tpu.memory_space<vmem>>, vector<1x8x64xf32>,
    return
  }
  func.func @transform_0(%arg0: i32) -> (i32, i32, i32) {
    %c0_i32 = arith.constant 0 : i32
    %c0_i32_0 = arith.constant 0 : i32
    %c0_i32_1 = arith.constant 0 : i32
    return %arg0, %c0_i32, %c0_i32_0 : i32, i32, i32
  }
  func.func @transform_1(%arg0: i32) -> (i32, i32) {
    %c0_i32 = arith.constant 0 : i32
    %c0_i32_0 = arith.constant 0 : i32
    %c0_i32_1 = arith.constant 0 : i32
    return %c0_i32, %c0_i32_0 : i32, i32
  }
  func.func @transform_2(%arg0: i32) -> (i32, i32) {
    %c0_i32 = arith.constant 0 : i32
    %c0_i32_0 = arith.constant 0 : i32
    %c0_i32_1 = arith.constant 0 : i32
    return %c0_i32, %c0_i32_0 : i32, i32
  }
  func.func @transform_3(%arg0: i32) -> (i32, i32) {
    %c0_i32 = arith.constant 0 : i32
    %c0_i32_0 = arith.constant 0 : i32
    %c0_i32_1 = arith.constant 0 : i32
    return %c0_i32, %c0_i32_0 : i32, i32
  }
  func.func @transform_4(%arg0: i32) -> (i32, i32) {
    %c0_i32 = arith.constant 0 : i32
    %c0_i32_0 = arith.constant 0 : i32
    %c0_i32_1 = arith.constant 0 : i32
    return %c0_i32, %c0_i32_0 : i32, i32
  }
  func.func @transform_5(%arg0: i32) -> (i32, i32) {
    %c0_i32 = arith.constant 0 : i32
    %c0_i32_0 = arith.constant 0 : i32
    %c0_i32_1 = arith.constant 0 : i32
    return %c0_i32, %c0_i32_0 : i32, i32
  }
  func.func @transform_6(%arg0: i32) -> (i32, i32) {
    %c0_i32 = arith.constant 0 : i32
    %c0_i32_0 = arith.constant 0 : i32
    %c0_i32_1 = arith.constant 0 : i32
    return %c0_i32, %c0_i32_0 : i32, i32
  }
  func.func @transform_7(%arg0: i32) -> (i32, i32, i32) {
    %c0_i32 = arith.constant 0 : i32
    %c0_i32_0 = arith.constant 0 : i32
    %c0_i32_1 = arith.constant 0 : i32
    return %arg0, %c0_i32, %c0_i32_0 : i32, i32, i32
  }
}

</mosaic_0001>

<bundles_post_ra>
// kernel: tpu_custom_call.1
= control target key start
LH: loop header
LB: loop body
LE: loop exit
PB: predicated region body
PF: predicated region fallthrough
CT: control target
= control target key end

     0   :  { %12 = vsyncpa [#allocation4], 0  ;;  %s1839_s0 = inlined_call_operand.vmem [shape: bf16[2,36,384], index: 0, kind: input, shape index: {}]   ;;  %s1840_s1 = inlined_call_operand.vmem [shape: bf16[8,36], index: 1, kind: input, shape index: {}]   ;;  %s1841_s2 = inlined_call_operand.vmem [shape: f32[8,1], index: 2, kind: input, shape index: {}]   ;;  %s1842_s3 = inlined_call_operand.vmem [shape: bf16[8,76], index: 3, kind: input, shape index: {}]   ;;  %s1843_s4 = inlined_call_operand.vmem [shape: f32[8,1], index: 4, kind: input, shape index: {}]   ;;  %s1844_s5 = inlined_call_operand.vmem [shape: f32[1,384], index: 5, kind: input, shape index: {}]   ;;  %s1845_s6 = inlined_call_operand.vmem [shape: bf16[384,64], index: 6, kind: input, shape index: {}]   ;;  %s1846_s7 = inlined_call_operand.hbm [shape: f32[2,8,64], index: 7, kind: output, shape index: {}]  }
   0x1   :  { %14 = vsyncpa [#allocation4 + $0x1], 0  ;;  %s1589_s24 = smov 0   ;;  %s1591_s25 = smov 0  }
   0x2   :  { %s1593_s26 = smov 0   ;;  %s1595_s27 = smov 0  }
   0x3 LB: > { %s1610_s28 = sadd.s32 4294967295, %s1535_s27   ;;  %s1205_s29 = sadd.s32 4294967294, %s1535_s27   ;;  %s1535_s27 = sphi %s1595_s27, %s1852_s27   ;;  %s1531_s26 = sphi %s1593_s26, %s1851_s26   ;;  %s1527_s25 = sphi %s1591_s25, %s1850_s25   ;;  %s1523_s24 = sphi %s1589_s24, %s1849_s24  }
   0x4   : > { %s1614_s30 = sadd.s32 1, %s1535_s27   ;;  %s179_s8 = sadd.s32 1, %s1531_s26 }
   0x5   : > { %s176_s9 = ssub.s32 %s1535_s27, %s1614_s30  ;;  %p189_p0 = scmp.ne.s32.totalorder %s1531_s26, %s1527_s25 }
   0x6   : > { %p177_p1 = scmp.eq.s32.totalorder %s176_s9, 0  ;;  %p190_p2 = scmp.eq.s32.totalorder %s1610_s28, 1 }
   0x7   : > { %p195_p3 = scmp.ne.s32.totalorder %s1527_s25, %s1523_s24  ;;  %p196_p4 = scmp.eq.s32.totalorder %s1205_s29, 1 }
   0x8   : > { %s1625_s10 = scalar_select %p177_p1, %s1531_s26, %s179_s8  }
   0x9   : > { %p1627_p5 = por %p190_p2, %p189_p0  ;;  %p1631_p6 = por %p196_p4, %p195_p3 }
   0xa   : > { %p1208_p7 = scmp.ge.s32.totalorder %s1535_s27, 1  ;;  %p240_p8 = scmp.lt.s32.totalorder %s1535_s27, 3 }
   0xc   : > { %p241_p9 = pnand %p1208_p7, %p240_p8 }
   0xd   : > { %p272_p10 = scmp.lt.s32.totalorder (!%p241_p9), %s1610_s28, 1  ;;  %s1540_s29 = smov (!%p241_p9), 109  }
   0xe   : > { %244 = sbr.rel (%p241_p9) target bundleno = 819 (0x333), region = 48  ;;  %s1541_s8 = smov (!%p241_p9), 110  }
   0xf   : > { %s1542_s9 = smov (!%p241_p9), 111   ;;  %s1543_s13 = smov (!%p241_p9), 17  }
  0x10   : > { %s1544_s14 = smov (!%p241_p9), 127   ;;  %s1547_s17 = smov (!%p241_p9), 18  }
  0x11   : > { %s1548_s23 = smov (!%p241_p9), [#allocation3]  }
  0x13   : > { %v280_v0 = vld [vmem:[%s1841_s2] sm:$0xff]  ;;  %v1537_v1 = vmov 0.0   ;;  %v1538_v2 = vmov 0   ;;  %s273_s15 = scalar_select %p272_p10, %s1610_s28, 1  ;;  %vm1539_vm0 = vmmov 0   ;;  %vm342_vm1 = vcmask 1041408  }
  0x14   : > { %1330 = vmatprep.subr.bf16.mxu1 %v1537_v1  ;;  %384 = vmatprep.mubr.bf16.mxu0 %v1538_v2  ;;  %vm338_vm2 = vcmask 293888   ;;  %v278_v15 = vld [vmem:[%s1840_s1] sm:$0xf]  ;;  %v437_v16 = vlaneseq  ;;  %vm637_vm3 = vcmask 891904   ;;  %vm614_vm4 = vcmask 900096  }
  0x15   : > { %1336 = vmatprep.mubr.msk.bf16.mxu1 %vm1539_vm0, %v1537_v1  ;;  %1425 = vset.pattern.permute.xlu0 %v1538_v2  ;;  %s1374_s16 = smul.u32 60, %s273_s15  ;;  %v282_v21 = vld [vmem:[%s1844_s5] sm:$0x7]  ;;  %s1545_s15 = smov 1   ;;  %vm591_vm5 = vcmask 908288   ;;  %vm764_vm6 = vcmask 1045504  }
  0x16   : > { %295 = vperm.xlu0 %1425, %v280_v0   ;;  %1426 = vset.pattern.permute.xlu1 %v1538_v2  ;;  %v438_v17 = vshrl.u32 %v437_v16, 7  ;;  %v281_v49 = vld [vmem:[%s1843_s4] sm:$0xff]  ;;  %vm568_vm7 = vcmask 1039360   ;;  %vm513_vm8 = vcmask 138240   ;;  %vm536_vm9 = vcmask 7168  }
  0x17   : > { %s1648_s19 = scalar_lea.vmem %s1839_s0, %s1374_s16  ;;  %s1546_s16 = smov 19   ;;  %vm467_vm10 = vcmask 154624   ;;  %vm490_vm11 = vcmask 146432   ;;  %vm760_vm12 = vcmask 621568   ;;  %vm1130_vm13 = vcmask 523264  }
  0x18   : > { %v291_v3 = vld [vmem:[%s1648_s19 + $0x30] sm:$0x33]  ;;  %v1429_v6 = vld [vmem:[%s1648_s19 + $0x38] ss:$0 sps:$4 sm:$0x33]   ;;  %v439_v18 = vsub.s32 0, %v438_v17 }
  0x19   : > { %v1218_v4 = vcombine.high %v291_v3, %v291_v3  ;;  %v1217_v5 = vcombine.low %v291_v3, %v291_v3  ;;  %v1430_v7 = vld [vmem:[%s1648_s19 + $0x1c] ss:$12 sps:$4 sm:$0xff]   ;;  %v350_v9 = vsel %vm342_vm1, %v1429_v6, 0  ;;  %v1432_v10 = vld [vmem:[%s1648_s19 + $0x18] ss:$12 sps:$4 sm:$0xff]   ;;  %v447_v19 = vsub.s32 2, %v438_v17 }
  0x1a   : > { %1331 = vmatpush3.bf16.msra.mxu1 %v350_v9  ;;  %v1433_v11 = vld [vmem:[%s1648_s19 + $0x20] ss:$12 sps:$4 sm:$0xff]   ;;  %v1434_v12 = vld [vmem:[%s1648_s19 + $0x4] ss:$12 sps:$4 sm:$0xff]   ;;  %v1437_v14 = vld [vmem:[%s1648_s19 + $0x8] ss:$12 sps:$4 sm:$0xff]   ;;  %v440_v27 = vrot.slane %v282_v21, %v439_v18 }
  0x1b   : > { %1220 = vmatprep.subr.msk.bf16.mxu0 %vm342_vm1, %v1218_v4  ;;  %v344_v8 = vsel %vm342_vm1, %v1217_v5, 0  ;;  %1332 = vmatprep.subr.bf16.mxu1 %v1537_v1  ;;  %v1436_v13 = vld [vmem:[%s1648_s19] ss:$12 sps:$4 sm:$0xff]   ;;  %v443_v22 = vsub.s32 1, %v438_v17  ;;  %v448_v29 = vrot.slane %v282_v21, %v447_v19  ;;  %v654_v47 = vld [vmem:[%s1648_s19 + $0x18] sm:$0x33] }
  0x1c   : > { %363 = vmatpush1.bf16.msra.mxu0 %v344_v8  ;;  %v655_v23 = vld [vmem:[%s1648_s19 + $0x20] sm:$0x3]  ;;  %656 = vst [vmem:[#allocation2 + $0x6c] sm:$0x33] %v654_v47 }
  0x1d   : > { %364 = vmatprep.subr.bf16.mxu0 %v1430_v7  ;;  %657 = vst [vmem:[#allocation2 + $0x74] sm:$0x3] %v655_v23  ;;  %v444_v35 = vrot.slane %v282_v21, %v443_v22 }
  0x1e   : > { %1333 = vmatpush3.bf16.msra.mxu1 %v1433_v11 }
  0x1f   : > { %1334 = vmatprep.subr.bf16.mxu1 %v1537_v1 }
  0x20   : > { %365 = vmatpush1.bf16.msra.mxu0 %v1432_v10 }
  0x21   : > { %366 = vmatprep.subr.bf16.mxu0 %v1434_v12 }
  0x22   : > { %1335 = vmatpush3.bf16.msra.mxu1 %v1437_v14 }
  0x23   : > { %1340 = vmatprep.subr.bf16.mxu1 %v1537_v1  ;;  %v676_v14 = vld [vmem:[#allocation2 + $0x6c] sm:$0x33] }
  0x24   : > { %367 = vmatpush1.bf16.msra.mxu0 %v1436_v13 }
  0x25   : > { %1337 = vmatmul.mubr.msk.bf16.vlgmr.msra.gmra.mxu1 %vm338_vm2, %v278_v15 }
  0x26   : > { %1350 = vmatprep.mubr.msk.bf16.mxu1 %vm1539_vm0, %v1537_v1 }
  0x27   : > { %1221 = vmatmul.mubr.msk.bf16.vlgmr.msra.gmra.mxu0 %vm338_vm2, %v278_v15 }
  0x28   : > { %806 = vmatprep.mubr.bf16.mxu0 %v1538_v2 }
  0x91   : > { %v296_v20 = vpop.permute.xlu0 %295 }
  0xe5   : > { %v427_v25 = vpop.f32.mrf.mxu1 }
  0xe6   : > { %v428_v28 = vadd.f32 %v427_v25, %v296_v20 }
  0xe7   : > { %v386_v24 = vpop.f32.mrf.mxu0  ;;  %v1338_v31 = vpop.f32.mrf.mxu1 }
  0xe8   : > { %v387_v26 = vadd.f32 %v386_v24, %v296_v20  ;;  %v435_v33 = vmax.f32 %v428_v28, 0.0 }
  0xe9   : > { %v388_v30 = vpop.f32.mrf.mxu0  ;;  %v430_v37 = vpop.f32.mrf.mxu1 }
  0xea   : > { %v433_v32 = vmax.f32 %v387_v26, 0.0  ;;  %v389_v34 = vadd.f32 %v388_v30, %v296_v20  ;;  %v454_v39 = vmul.f32 %v448_v29, %v435_v33 }
  0xeb   : > { %v390_v36 = vpop.f32.mrf.mxu0  ;;  %v1339_v42 = vpop.f32.mrf.mxu1 }
  0xec   : > { %v452_v38 = vmul.f32 %v440_v27, %v433_v32  ;;  %v434_v40 = vmax.f32 %v389_v34, 0.0  ;;  %v457_v44 = vpack.c.bf16 %v454_v39, %v454_v39 }
  0xed   : > { %v391_v41 = vpop.f32.mrf.mxu0 }
  0xee   : > { %v455_v43 = vpack.c.bf16 %v452_v38, %v452_v38  ;;  %v453_v45 = vmul.f32 %v444_v35, %v434_v40  ;;  %561 = vst [vmem:[#allocation2 + $0x38] sm:$0xf] %v457_v44  ;;  %635 = vrot.lane.b32.xlu1 %v457_v44, %s1540_s29 }
  0xf0   : > { %v1670_v46 = vpack.c.bf16 %v453_v45, %v452_v38  ;;  %631 = vrot.lane.b32.xlu0 %v455_v43, %s1540_s29  ;;  %v456_v48 = vpack.c.bf16 %v453_v45, %v453_v45 }
  0xf2   : > { %608 = vrot.lane.b32.xlu1 %v455_v43, %s1541_s8 }
  0xf4   : > { %585 = vrot.lane.b32.xlu0 %v455_v43, %s1542_s9 }
  0xf6   : > { %612 = vrot.lane.b32.xlu1 %v457_v44, %s1541_s8 }
  0xf8   : > { %589 = vrot.lane.b32.xlu0 %v457_v44, %s1542_s9 }
  0xfa   : > { %507 = vrot.lane.b32.xlu1 %v457_v44, %s1543_s13 }
  0xfc   : > { %562 = vrot.lane.b32.xlu0 %v455_v43, %s1544_s14 }
  0xfe   : > { %532 = vrot.lane.b32.xlu1 %v455_v43, %s1545_s15 }
 0x100   : > { %566 = vrot.lane.b32.xlu0 %v457_v44, %s1544_s14 }
 0x102   : > { %459 = vrot.lane.b32.xlu1 %v457_v44, %s1546_s16 }
 0x104   : > { %509 = vrot.lane.b32.xlu0 %v455_v43, %s1543_s13 }
 0x106   : > { %633 = vrot.lane.b32.xlu1 %v456_v48, %s1540_s29  ;;  %s1479_s29 = sshll.u32 %s1548_s23, 4  ;;  %s1480_s29 = int_to_ptr.vmem [resolvable:$false] %s1479_s29 }
 0x108   : > { %530 = vrot.lane.b32.xlu0 %v457_v44, %s1545_s15 }
 0x10a   : > { %587 = vrot.lane.b32.xlu1 %v456_v48, %s1542_s9 }
 0x10c   : > { %463 = vrot.lane.b32.xlu0 %v455_v43, %s1546_s16 }
 0x10e   : > { %564 = vrot.lane.b32.xlu1 %v456_v48, %s1544_s14  ;;  %s269_s14 = sand.u32 1, %s1527_s25  }
 0x110   : > { %610 = vrot.lane.b32.xlu0 %v456_v48, %s1541_s8  ;;  %s1481_s8 = scalar_lea.vmem %s1480_s29, 256 }
 0x112   : > { %511 = vrot.lane.b32.xlu1 %v456_v48, %s1543_s13 }
 0x114   : > { %484 = vrot.lane.b32.xlu0 %v457_v44, %s1547_s17 }
 0x116   : > { %465 = vrot.lane.b32.xlu1 %v456_v48, %s1546_s16  ;;  %s1284_s16 = sshll.u32 %s1610_s28, 7  ;;  %s1133_s28 = scalar_lea.sflag [#allocation4], %s269_s14 }
 0x117   : > { %s1798_s21 = scalar_lea.hbm %s1846_s7, %s1284_s16 }
 0x118   : > { %534 = vrot.lane.b32.xlu0 %v456_v48, %s1545_s15  ;;  %s1209_s15 = sshll.u32 %s269_s14, 3 }
 0x11a   : > { %486 = vrot.lane.b32.xlu1 %v455_v43, %s1547_s17 }
 0x11c   : > { %488 = vrot.lane.b32.xlu0 %v456_v48, %s1547_s17  ;;  %s271_s17 = scalar_lea.vmem [#allocation3], %s1209_s15 }
 0x11d   : > { %s1146_s18 = sshll.u32 %s271_s17, 4  ;;  %s1800_s18 = int_to_ptr.vmem [resolvable:$true] %s1146_s18 }
 0x11e   : > { %680 = vperm.xlu1 %1426, %v281_v49   ;;  %s1475_s22 = scalar_lea.vmem %s1800_s18, 128  ;;  %p1482_p0 = scmp.lt.s32.totalorder %s1800_s18, %s1480_s29 }
 0x11f   : > { %p1476_p11 = scmp.ne.s32.totalorder %s1800_s18, %s1475_s22  ;;  %p1483_p1 = scmp.lt.s32.totalorder %s1481_s8, %s1475_s22 }
 0x121   : > { %p1477_p12 = pnand %p1476_p11, %p1627_p5  ;;  %p1484_p2 = por %p1483_p1, %p1482_p0 }
 0x123   : > { %p1478_p13 = pneg %p1477_p12 }
 0x125   : > { %p1485_p3 = pnand %p1484_p2, %p1478_p13 }
 0x160   : > { %v636_v50 = vpop.permute.xlu1 %635 }
 0x162   : > { %v632_v51 = vpop.permute.xlu0 %631 }
 0x163   : > { %v643_v52 = vsel %vm637_vm3, %v636_v50, %v632_v51 }
 0x164   : > { %v1240_v53 = vcombine.low %v643_v52, %v643_v52  ;;  %v609_v54 = vpop.permute.xlu1 %608 }
 0x166   : > { %653 = vst [vmem:[#allocation2 + $0x68] sm:$0xf] %v1240_v53  ;;  %v586_v55 = vpop.permute.xlu0 %585 }
 0x168   : > { %v613_v56 = vpop.permute.xlu1 %612 }
 0x169   : > { %v620_v58 = vsel %vm614_vm4, %v613_v56, %v609_v54 }
 0x16a   : > { %v590_v57 = vpop.permute.xlu0 %589  ;;  %v1238_v60 = vcombine.low %v620_v58, %v620_v58 }
 0x16b   : > { %v597_v59 = vsel %vm591_vm5, %v590_v57, %v586_v55 }
 0x16c   : > { %v1236_v61 = vcombine.low %v597_v59, %v597_v59  ;;  %630 = vst [vmem:[#allocation2 + $0x5c] sm:$0xf] %v1238_v60  ;;  %v508_v63 = vpop.permute.xlu1 %507 }
 0x16d   : > { %v1438_v62 = vld [vmem:[#allocation2 + $0x68] ss:$12 sps:$4 sm:$0x3f]  }
 0x16e   : > { %607 = vst [vmem:[#allocation2 + $0x50] sm:$0xf] %v1236_v61  ;;  %v563_v0 = vpop.permute.xlu0 %562  ;;  %v772_v2 = vsel %vm764_vm6, %v1438_v62, 0  ;;  %v1444_v61 = vld [vmem:[%s1845_s6 + $0x78] sm:$0xff]   ;;  %v279_v62 = vld [vmem:[%s1842_s3] sm:$0xf] }
 0x16f   : > { %1341 = vmatpush3.bf16.msra.mxu1 %v772_v2  ;;  %v1447_v2 = vld [vmem:[%s1845_s6 + $0x70] sm:$0xff]  }
 0x170   : > { %1342 = vmatprep.subr.bf16.mxu1 %v1537_v1  ;;  %v533_v3 = vpop.permute.xlu1 %532 }
 0x172   : > { %v567_v4 = vpop.permute.xlu0 %566 }
 0x173   : > { %v574_v5 = vsel %vm568_vm7, %v567_v4, %v563_v0 }
 0x174   : > { %v1234_v6 = vcombine.low %v574_v5, %v574_v5  ;;  %v460_v8 = vpop.permute.xlu1 %459  ;;  %v1450_v5 = vld [vmem:[%s1845_s6 + $0x68] sm:$0xff]  }
 0x175   : > { %v1439_v7 = vld [vmem:[#allocation2 + $0x50] ss:$12 sps:$4 sm:$0xff]  }
 0x176   : > { %584 = vst [vmem:[#allocation2 + $0x44] sm:$0xf] %v1234_v6  ;;  %v510_v9 = vpop.permute.xlu0 %509  ;;  %1343 = vmatpush3.bf16.msra.mxu1 %v1439_v7  ;;  %v1443_v6 = vld [vmem:[%s1845_s6 + $0xb8] sm:$0xff]   ;;  %v1451_v7 = vld [vmem:[%s1845_s6 + $0x28] sm:$0xff]  }
 0x177   : > { %1344 = vmatprep.subr.bf16.mxu1 %v1537_v1  ;;  %v519_v35 = vsel %vm513_vm8, %v508_v63, %v510_v9 }
 0x178   : > { %v634_v10 = vpop.permute.xlu1 %633 }
 0x179   : > { %v638_v12 = vsel %vm637_vm3, %v632_v51, %v634_v10  ;;  %v639_v13 = vsel %vm637_vm3, %v634_v10, %v636_v50  ;;  %v1454_v10 = vld [vmem:[%s1845_s6 + $0x20] sm:$0xff]  }
 0x17a   : > { %v531_v11 = vpop.permute.xlu0 %530  ;;  %v1239_v15 = vcombine.low %v638_v12, %v639_v13  ;;  %v1467_v20 = vcombine.low %v638_v12, %v676_v14  ;;  %v1449_v12 = vld [vmem:[%s1845_s6 + $0xa8] sm:$0xff]   ;;  %v1457_v13 = vld [vmem:[%s1845_s6 + $0x18] sm:$0xff]  }
 0x17b   : > { %v542_v40 = vsel %vm536_vm9, %v531_v11, %v533_v3 }
 0x17c   : > { %v588_v17 = vpop.permute.xlu1 %587  ;;  %v1254_v19 = vcombine.high %v1239_v15, %v676_v14  ;;  %v766_v23 = vsel %vm764_vm6, %v1467_v20, 0  ;;  %v1459_v14 = vld [vmem:[%s1845_s6 + $0x50] sm:$0xff]   ;;  %v1452_v15 = vld [vmem:[%s1845_s6 + $0xa0] sm:$0xff]   ;;  %v1462_v20 = vld [vmem:[%s1845_s6 + $0x48] sm:$0xff]  }
 0x17d   : > { %v1440_v16 = vld [vmem:[#allocation2 + $0x38] ss:$12 sps:$4 sm:$0xff]   ;;  %v592_v21 = vsel %vm591_vm5, %v586_v55, %v588_v17  ;;  %v593_v22 = vsel %vm591_vm5, %v588_v17, %v590_v57 }
 0x17e   : > { %v464_v18 = vpop.permute.xlu0 %463  ;;  %1345 = vmatpush3.bf16.msra.mxu1 %v1440_v16  ;;  %1256 = vmatprep.subr.msk.bf16.mxu0 %vm764_vm6, %v1254_v19  ;;  %v1460_v16 = vld [vmem:[%s1845_s6 + $0x10] sm:$0xff]   ;;  %v1455_v17 = vld [vmem:[%s1845_s6 + $0x98] sm:$0xff]   ;;  %v1461_v19 = vld [vmem:[%s1845_s6 + $0x88] sm:$0xff]  }
 0x17f   : > { %1346 = vmatprep.subr.bf16.mxu1 %v1537_v1  ;;  %781 = vmatpush1.bf16.msra.mxu0 %v766_v23  ;;  %v473_v41 = vsel %vm467_vm10, %v460_v8, %v464_v18  ;;  %v1466_v23 = vld [vmem:[%s1845_s6] sm:$0xff]  }
 0x180   : > { %v565_v24 = vpop.permute.xlu1 %564 }
 0x181   : > { %v569_v26 = vsel %vm568_vm7, %v563_v0, %v565_v24  ;;  %v570_v27 = vsel %vm568_vm7, %v565_v24, %v567_v4  ;;  %v1448_v4 = vld [vmem:[%s1845_s6 + $0x30] sm:$0xff]  }
 0x182   : > { %v611_v25 = vpop.permute.xlu0 %610  ;;  %v1233_v30 = vcombine.low %v569_v26, %v570_v27  ;;  %v1470_v44 = vcombine.low %v1670_v46, %v569_v26 }
 0x183   : > { %v615_v28 = vsel %vm614_vm4, %v609_v54, %v611_v25  ;;  %v616_v29 = vsel %vm614_vm4, %v611_v25, %v613_v56  ;;  %v1471_v54 = vcombine.low %v519_v35, %v542_v40 }
 0x184   : > { %v512_v31 = vpop.permute.xlu1 %511  ;;  %v1468_v33 = vcombine.low %v592_v21, %v615_v28  ;;  %v1469_v34 = vcombine.low %v593_v22, %v616_v29  ;;  %v1248_v39 = vcombine.high %v1670_v46, %v1233_v30  ;;  %v1463_v21 = vld [vmem:[%s1845_s6 + $0x8] sm:$0xff]   ;;  %v1465_v22 = vld [vmem:[%s1845_s6 + $0x40] sm:$0xff]  }
 0x185   : > { %v514_v36 = vsel %vm513_vm8, %v510_v9, %v512_v31  ;;  %v515_v37 = vsel %vm513_vm8, %v512_v31, %v508_v63  ;;  %v1445_v63 = vld [vmem:[%s1845_s6 + $0x38] sm:$0xff]   ;;  %v1446_v9 = vld [vmem:[%s1845_s6 + $0xb0] sm:$0xff]  }
 0x186   : > { %v485_v32 = vpop.permute.xlu0 %484  ;;  %v1228_v38 = vcombine.low %v515_v37, %v515_v37  ;;  %782 = vmatprep.subr.bf16.mxu0 %v1469_v34 }
 0x187   : > { %783 = vmatpush1.bf16.msra.mxu0 %v1468_v33 }
 0x188   : > { %529 = vst [vmem:[#allocation2 + $0x20] sm:$0xf] %v1228_v38  ;;  %v466_v42 = vpop.permute.xlu1 %465  ;;  %784 = vmatprep.subr.bf16.mxu0 %v1248_v39 }
 0x189   : > { %v468_v45 = vsel %vm467_vm10, %v464_v18, %v466_v42  ;;  %v469_v47 = vsel %vm467_vm10, %v466_v42, %v460_v8  ;;  %v1453_v8 = vld [vmem:[%s1845_s6 + $0x60] sm:$0xff]   ;;  %v1458_v18 = vld [vmem:[%s1845_s6 + $0x90] sm:$0xff]  }
 0x18a   : > { %v535_v43 = vpop.permute.xlu0 %534  ;;  %v1224_v50 = vcombine.low %v469_v47, %v469_v47 }
 0x18b   : > { %v537_v48 = vsel %vm536_vm9, %v533_v3, %v535_v43  ;;  %v538_v49 = vsel %vm536_vm9, %v535_v43, %v531_v11  ;;  %785 = vmatpush1.bf16.msra.mxu0 %v1470_v44  ;;  %v1456_v11 = vld [vmem:[%s1845_s6 + $0x58] sm:$0xff]  }
 0x18c   : > { %v1230_v51 = vcombine.low %v538_v49, %v538_v49  ;;  %483 = vst [vmem:[#allocation2 + $0x8] sm:$0xf] %v1224_v50  ;;  %v487_v52 = vpop.permute.xlu1 %486  ;;  %v1472_v55 = vcombine.low %v514_v36, %v537_v48 }
 0x18d   : > { %v496_v46 = vsel %vm490_vm11, %v485_v32, %v487_v52 }
 0x18e   : > { %552 = vst [vmem:[#allocation2 + $0x2c] sm:$0xf] %v1230_v51  ;;  %v489_v53 = vpop.permute.xlu0 %488  ;;  %786 = vmatprep.subr.bf16.mxu0 %v1472_v55  ;;  %v1473_v59 = vcombine.low %v473_v41, %v496_v46 }
 0x18f   : > { %v491_v56 = vsel %vm490_vm11, %v487_v52, %v489_v53  ;;  %v492_v57 = vsel %vm490_vm11, %v489_v53, %v485_v32  ;;  %787 = vmatpush1.bf16.msra.mxu0 %v1471_v54 }
 0x190   : > { %v1226_v58 = vcombine.low %v492_v57, %v492_v57  ;;  %v1474_v60 = vcombine.low %v468_v45, %v491_v56 }
 0x192   : > { %506 = vst [vmem:[#allocation2 + $0x14] sm:$0xf] %v1226_v58  ;;  %788 = vmatprep.subr.bf16.mxu0 %v1474_v60 }
 0x193   : > { %789 = vmatpush1.bf16.msra.mxu0 %v1473_v59 }
 0x194   : > { %1299 = vmatprep.subr.bf16.mxu0 %v1444_v61 }
 0x195   : > { %v1441_v0 = vld [vmem:[#allocation2 + $0x20] ss:$12 sps:$4 sm:$0xff]  }
 0x196   : > { %1347 = vmatpush3.bf16.msra.mxu1 %v1441_v0  ;;  %1257 = vmatmul.mubr.msk.bf16.vlgmr.msra.gmra.mxu0 %vm760_vm12, %v279_v62 }
 0x197   : > { %1348 = vmatprep.subr.bf16.mxu1 %v1537_v1  ;;  %1300 = vmatpush3.bf16.msra.mxu0 %v1445_v63 }
 0x198   : > { %1301 = vmatprep.subr.bf16.mxu0 %v1447_v2 }
 0x199   : > { %v1442_v3 = vld [vmem:[#allocation2 + $0x8] ss:$12 sps:$4 sm:$0xff]   ;;  %v681_v24 = vpop.permute.xlu1 %680 }
 0x19a   : > { %1349 = vmatpush3.bf16.msra.mxu1 %v1442_v3 }
 0x19b   : > { %1354 = vmatprep.subr.bf16.mxu1 %v1537_v1  ;;  %1302 = vmatpush3.bf16.msra.mxu0 %v1448_v4 }
 0x19c   : > { %1303 = vmatprep.subr.bf16.mxu0 %v1450_v5 }
 0x19d   : > { %1351 = vmatmul.mubr.msk.bf16.vlgmr.msra.gmra.mxu1 %vm760_vm12, %v279_v62 }
 0x19e   : > { %1355 = vmatpush3.bf16.msra.mxu1 %v1443_v6  ;;  %1370 = vmatprep.mubr.msk.bf16.mxu1 %vm1539_vm0, %v1537_v1 }
 0x19f   : > { %1356 = vmatprep.subr.bf16.mxu1 %v1537_v1  ;;  %1304 = vmatpush3.bf16.msra.mxu0 %v1451_v7 }
 0x1a0   : > { %1305 = vmatprep.subr.bf16.mxu0 %v1453_v8 }
 0x1a2   : > { %1357 = vmatpush3.bf16.msra.mxu1 %v1446_v9 }
 0x1a3   : > { %1358 = vmatprep.subr.bf16.mxu1 %v1537_v1  ;;  %1306 = vmatpush3.bf16.msra.mxu0 %v1454_v10 }
 0x1a4   : > { %1307 = vmatprep.subr.bf16.mxu0 %v1456_v11 }
 0x1a6   : > { %1359 = vmatpush3.bf16.msra.mxu1 %v1449_v12 }
 0x1a7   : > { %1360 = vmatprep.subr.bf16.mxu1 %v1537_v1  ;;  %1308 = vmatpush3.bf16.msra.mxu0 %v1457_v13 }
 0x1a8   : > { %1309 = vmatprep.subr.bf16.mxu0 %v1459_v14 }
 0x1aa   : > { %1361 = vmatpush3.bf16.msra.mxu1 %v1452_v15 }
 0x1ab   : > { %1362 = vmatprep.subr.bf16.mxu1 %v1537_v1  ;;  %1310 = vmatpush3.bf16.msra.mxu0 %v1460_v16 }
 0x1ac   : > { %1311 = vmatprep.subr.bf16.mxu0 %v1462_v20 }
 0x1ae   : > { %1363 = vmatpush3.bf16.msra.mxu1 %v1455_v17 }
 0x1af   : > { %1364 = vmatprep.subr.bf16.mxu1 %v1537_v1  ;;  %1312 = vmatpush3.bf16.msra.mxu0 %v1463_v21 }
 0x1b0   : > { %1313 = vmatprep.subr.bf16.mxu0 %v1465_v22 }
 0x1b2   : > { %1365 = vmatpush3.bf16.msra.mxu1 %v1458_v18 }
 0x1b3   : > { %1366 = vmatprep.subr.bf16.mxu1 %v1537_v1  ;;  %1314 = vmatpush3.bf16.msra.mxu0 %v1466_v23 }
 0x1b6   : > { %1367 = vmatpush3.bf16.msra.mxu1 %v1461_v19 }
 0x1b7   : > { %1368 = vmatprep.subr.bf16.mxu1 %v1537_v1  ;;  %v1464_v1 = vld [vmem:[%s1845_s6 + $0x80] sm:$0xff]  }
 0x1ba   : > { %1369 = vmatpush3.bf16.msra.mxu1 %v1464_v1 }
 0x256   : > { %v808_v25 = vpop.f32.mrf.mxu0 }
 0x257   : > { %v809_v26 = vadd.f32 %v808_v25, %v681_v24 }
 0x258   : > { %v810_v27 = vpop.f32.mrf.mxu0 }
 0x259   : > { %v811_v28 = vadd.f32 %v810_v27, %v681_v24  ;;  %v855_v32 = vpack.c.bf16 %v809_v26, %v809_v26 }
 0x25a   : > { %v812_v29 = vpop.f32.mrf.mxu0 }
 0x25b   : > { %v856_v30 = vpack.c.bf16 %v811_v28, %v811_v28 }
 0x25c   : > { %v813_v33 = vpop.f32.mrf.mxu0 }
 0x25d   : > { %v849_v31 = vpop.f32.mrf.mxu1  ;;  %1082 = vmatprep.mubr.bf16.mxu0 %v856_v30 }
 0x25e   : > { %v850_v34 = vadd.f32 %v849_v31, %v681_v24  ;;  %1083 = vmatmul.mubr.bf16.vlgmr.msra.gmra.mxu0 %v855_v32 }
 0x25f   : > { %v1352_v35 = vpop.f32.mrf.mxu1 }
 0x260   : > { %v857_v36 = vpack.c.bf16 %v850_v34, %v850_v34 }
 0x261   : > { %v852_v37 = vpop.f32.mrf.mxu1 }
 0x262   : > { %1371 = vmatmul.mubr.bf16.vlgmr.msra.gmra.mxu1 %v857_v36 }
 0x263   : > { %v1353_v38 = vpop.f32.mrf.mxu1 }
 0x31e   : > { %v1315_v39 = vpop.f32.mrf.mxu0 }
 0x320   : > { %v1316_v40 = vpop.f32.mrf.mxu0 }
 0x321   : > { %v1317_v42 = vadd.f32 %v1316_v40, %v1315_v39 }
 0x322   : > { %v1124_v41 = vpop.f32.mrf.mxu1  ;;  %v1318_v43 = vpop.f32.mrf.mxu0 }
 0x323   : > { %v1125_v45 = vadd.f32 %v1317_v42, %v1124_v41 }
 0x324   : > { %v1372_v44 = vpop.f32.mrf.mxu1  ;;  %v1319_v47 = vpop.f32.mrf.mxu0 }
 0x325   : > { %1131 = vst.msk [vmem:[%s271_s17] sm:$0xff] %vm1130_vm13, %v1125_v45 }
 0x326   : > { %v1127_v48 = vpop.f32.mrf.mxu1 }
 0x327   : > { %1488 = shalt.err (!%p1485_p3)
}
 0x328   : > { %s1489_s9 = scalar_lea.hbm %s1798_s21, 128  ;;  %s1493_s15 = scalar_lea.hbm %s1846_s7, 256 }
 0x329   : > { %p1490_p4 = scmp.ne.s32.totalorder %s1798_s21, %s1489_s9  ;;  %p1494_p9 = scmp.lt.s32.totalorder %s1798_s21, %s1846_s7 }
 0x32a   : > { %p1495_p10 = scmp.lt.s32.totalorder %s1493_s15, %s1489_s9 }
 0x32b   : > { %p1491_p7 = pnand %p1490_p4, %p1627_p5 }
 0x32c   : > { %p1496_p11 = por %p1495_p10, %p1494_p9 }
 0x32d   : > { %p1492_p8 = pneg %p1491_p7 }
 0x32f   : > { %p1497_p12 = pnand %p1496_p11, %p1492_p8 }
 0x331   : > { %1500 = shalt.err (!%p1497_p12)
}
 0x332   : > { %1375 = dma.vmem_to_hbm [thread:$0]  (%p1627_p5), %s1800_s18, 128, %s1798_s21, %s1133_s28   ;;  %v1373_v49 = vpop.f32.mrf.mxu1 }
 0x333 PF: > { %p1381_p13 = scmp.ge.s32.totalorder %s1535_s27, 2  ;;  %s1158_s19 = sand.u32 1, %s1523_s24  }
 0x334   : > { %s1159_s20 = scalar_lea.sflag [#allocation4], %s1158_s19 }
 0x335   : > { %p1378_p0 = pnand %p1381_p13, %p1631_p6 }
 0x337   : > { %p1379_p1 = pneg %p1378_p0 }
 0x339   : > { %1518 = dma.done.wait (%p1379_p1), %s1159_s20, 128  }
 0x33a   : > { %1520 = vsyncadd (%p1379_p1), %s1159_s20, 4294967168  ;;  %p17_p2 = scmp.ge.s32.totalorder %s1614_s30, 4   ;;  %s1849_s24 = smov %s1527_s25 }
 0x33b   : > { %s1850_s25 = smov %s1531_s26  ;;  %s1851_s26 = smov %s1625_s10 }
 0x33c   : > { %s1852_s27 = smov %s1614_s30  ;;  %19 = sbr.rel (!%p17_p2) target bundleno = 3 (0x3), region = 83 }
 0x341   :  { %1164 = vsyncpa [#allocation4], 1 }
 0x342   :  { %1166 = vsyncpa [#allocation4 + $0x1], 1 }

</bundles_post_ra>
